<compile_context>
chip_gen: v5e
topology: v5e:2x2
jax: 0.10.0
libtpu: 0.0.40
codegen_flags: <defaults>
</compile_context>

<pallas_src>
import jax
import jax.numpy as jnp
from jax.experimental import pallas as pl
from jax.experimental.pallas import tpu as pltpu


_MiB = 1024 * 1024
_DMA_MIN_ROW_BYTES = 1024  # per-key last-frame row size threshold for the pure-DMA path


def _vmem_capacity_bytes():
    try:
        return int(pltpu.get_tpu_info().vmem_capacity_bytes)
    except Exception:
        return 64 * _MiB  # conservative fallback: v7x per-TensorCore VMEM


def _pick_batch_tile(B, row_bytes, itemsize, budget):
    """Largest batch tile within `budget` bytes of double-buffered in+out tiles.

    dtype-aware sublane quantum (f32: 8, bf16: 16, int8/fp8: 32 rows); does NOT
    require tb to divide B (Pallas masks the ragged last block); caps tb so the
    grid has >= 2 steps whenever possible (keeps both v7x TensorCores busy).
    """
    q = max(8, 32 // max(1, itemsize))
    if B <= q:
        return B  # full-extent batch block is always a legal block shape
    max_rows = max(q, budget // max(1, 2 * row_bytes))
    tb = min(B, max_rows)
    if B >= 2 * q:  # ensure >= 2 grid steps (v7x: 2 TCs; harmless on v5e/v6e)
        half = -(-B // 2)            # ceil(B / 2)
        half = -(-half // q) * q     # round up to the sublane quantum
        tb = min(tb, half)
    tb = max(q, (tb // q) * q)       # round down to the sublane quantum
    return min(tb, B)


def identity_encoder(obs_dict, keys):
    """Pallas implementation of IdentityEncoder.forward (continuous_state=True).

    obs_dict: {key: [B, T, D_k]} frame-stacked observations.
    Returns [B, sum_k D_k] == concat([obs_dict[k][:, -1] for k in keys], -1).
    """
    inputs = [obs_dict[k] for k in keys]  # raw [B, T, D_k]; NO wrapper-side slice
    assert all(x.ndim == 3 for x in inputs), "expected frame-stacked [B, T, D_k] obs"
    dtypes = {x.dtype for x in inputs}
    assert len(dtypes) == 1, "torch.cat semantics require a single dtype"
    dtype = inputs[0].dtype
    itemsize = jnp.dtype(dtype).itemsize

    B = int(inputs[0].shape[0])
    Ts = [int(x.shape[1]) for x in inputs]
    dims = [int(x.shape[2]) for x in inputs]
    feature_dim = int(sum(dims))
    offs = [0]
    for d in dims:
        offs.append(offs[-1] + d)

    # ---- Path 1: production-sized features -> pure HBM->HBM DMA ----------------
    # One strided DMA per key, last frame straight into its output column slab.
    # No grid, no VMEM staging, no concat; data moves on the DMA engines only.
    if min(d * itemsize for d in dims) >= _DMA_MIN_ROW_BYTES:

        def dma_kernel(*refs):
            *in_refs, out_ref, sem = refs
            copies = []
            for k, r in enumerate(in_refs):
                t = r.shape[1]
                cp = pltpu.make_async_copy(
                    r.at[:, pl.ds(t - 1, 1), :],                # [B, 1, D_k] last frame
                    out_ref.at[:, :, pl.ds(offs[k], dims[k])],  # [B, 1, D_k] column slab
                    sem.at[k],
                )
                cp.start()
                copies.append(cp)
            for cp in copies:  # start all (overlap), then wait all
                cp.wait()

        out3 = pl.pallas_call(
            dma_kernel,
            out_shape=jax.ShapeDtypeStruct((B, 1, feature_dim), dtype),
            in_specs=[pl.BlockSpec(memory_space=pl.ANY) for _ in inputs],
            out_specs=pl.BlockSpec(memory_space=pl.ANY),
            scratch_shapes=[pltpu.SemaphoreType.DMA((len(inputs),))],
        )(*inputs)
        return out3.reshape(B, feature_dim)  # free metadata reshape

    # ---- Path 2: small features -> auto-pipelined VMEM copy --------------------
    # The last-frame select happens INSIDE the kernel (3-D block covering all T
    # frames), so no per-key HBM intermediate is materialized before the call.
    row_bytes = (sum(t * d for t, d in zip(Ts, dims)) + feature_dim) * itemsize
    vmem_cap = _vmem_capacity_bytes()
    budget = max(4 * _MiB, min(vmem_cap // 8, 24 * _MiB))  # ~8 MiB v7x, ~16 MiB v5e/v6e
    tb = _pick_batch_tile(B, row_bytes, itemsize, budget)
    grid = (pl.cdiv(B, tb),)
    aligned = all(d % 128 == 0 for d in dims)

    def vmem_kernel(*refs):
        *in_refs, out_ref = refs
        last = [r[:, r.shape[1] - 1, :] for r in in_refs]  # in-kernel [:, -1]
        if aligned:
            # 128-aligned slabs: each per-key store is already an unmasked vst,
            # and skipping the concat temporary halves the vreg/VMEM working set.
            for k, x in enumerate(last):
                out_ref[:, offs[k]:offs[k] + dims[k]] = x
        else:
            # Misaligned offsets: build the row once, issue ONE dense store.
            out_ref[...] = jnp.concatenate(last, axis=-1)

    est = 2 * tb * row_bytes  # double-buffered in+out working set
    vmem_limit = int(max(4 * _MiB, min(2 * est, vmem_cap // 2)))

    return pl.pallas_call(
        vmem_kernel,
        out_shape=jax.ShapeDtypeStruct((B, feature_dim), dtype),
        grid=grid,
        in_specs=[pl.BlockSpec((tb, t, d), lambda i: (i, 0, 0))
                  for t, d in zip(Ts, dims)],
        out_specs=pl.BlockSpec((tb, feature_dim), lambda i: (i, 0)),
        compiler_params=pltpu.CompilerParams(
            dimension_semantics=("parallel",),
            vmem_limit_bytes=vmem_limit,
        ),
    )(*inputs)


# TODO(synk): the discrete (continuous_state=False) branch returns a ragged *list*
# of per-feature one-hot tensors; not translated to a single Pallas kernel here.
# TODO(synk): the manipulation_test_scale eval-time randn-noise path is omitted
# (train-mode semantics only).


if __name__ == "__main__":
    rng = jax.random.PRNGKey(0)

    def make_obs(key_dims, B, T, dtype, rng):
        obs = {}
        for k, d in key_dims.items():
            rng, sub = jax.random.split(rng)
            obs[k] = jax.random.normal(sub, (B, T, d), dtype=jnp.float32).astype(dtype)
        return obs, rng

    def reference(obs, keys):
        return jnp.concatenate([obs[k][:, -1] for k in keys], axis=-1)

    # Case A: tiny misaligned feature dims (typical robot-state obs)
    # -> VMEM pipeline, single dense concat store.
    keys_a = ["robot_state", "object_pos", "goal"]
    dims_a = {"robot_state": 9, "object_pos": 6, "goal": 3}
    obs_a, rng = make_obs(dims_a, B=4, T=3, dtype=jnp.float32, rng=rng)
    out_a = jax.block_until_ready(identity_encoder(obs_a, keys_a))
    assert out_a.shape == (4, 18), out_a.shape
    assert jnp.array_equal(out_a, reference(obs_a, keys_a)), "case A mismatch"

    # Case B: 128-aligned dims, bf16, multi-step batch grid
    # -> VMEM pipeline, per-key unmasked stores, 16-row (bf16) tile quantum.
    keys_b = ["proprio", "lidar"]
    dims_b = {"proprio": 128, "lidar": 256}
    obs_b, rng = make_obs(dims_b, B=64, T=2, dtype=jnp.bfloat16, rng=rng)
    out_b = jax.block_until_ready(identity_encoder(obs_b, keys_b))
    assert out_b.shape == (64, 384), out_b.shape
    assert jnp.array_equal(out_b, reference(obs_b, keys_b)), "case B mismatch"

    # Case C: production-sized feature rows -> pure HBM->HBM DMA path.
    keys_c = ["state", "goal_emb"]
    dims_c = {"state": 512, "goal_emb": 384}
    obs_c, rng = make_obs(dims_c, B=8, T=2, dtype=jnp.float32, rng=rng)
    out_c = jax.block_until_ready(identity_encoder(obs_c, keys_c))
    assert out_c.shape == (8, 896), out_c.shape
    assert jnp.array_equal(out_c, reference(obs_c, keys_c)), "case C mismatch"

    print("KERNEL_OK")
</pallas_src>

<mosaic_0001>
module attributes {stable_mosaic.version = 11 : i64} {
  func.func @vmem_kernel(%arg0: i32, %arg1: memref<4x3x9xf32, #tpu.memory_space<vmem>>, %arg2: memref<4x3x6xf32, #tpu.memory_space<vmem>>, %arg3: memref<4x3x3xf32, #tpu.memory_space<vmem>>, %arg4: memref<4x18xf32, #tpu.memory_space<vmem>>) attributes {dimension_semantics = [#tpu.dimension_semantics<parallel>], iteration_bounds = array<i64: 1>, scalar_prefetch = 0 : i64, scratch_operands = 0 : i64, tpu.core_type = #tpu.core_type<tc>, window_params = [{transform_indices = @transform_0, window_bounds = array<i64: 4, 3, 9>}, {transform_indices = @transform_1, window_bounds = array<i64: 4, 3, 6>}, {transform_indices = @transform_2, window_bounds = array<i64: 4, 3, 3>}, {transform_indices = @transform_3, window_bounds = array<i64: 4, 18>}]} {
    %c0 = arith.constant 0 : index
    %c2 = arith.constant 2 : index
    %c0_0 = arith.constant 0 : index
    %0 = vector.load %arg1[%c0, %c2, %c0_0] : memref<4x3x9xf32, #tpu.memory_space<vmem>>, vector<4x1x9xf32>
    %1 = vector.shape_cast %0 : vector<4x1x9xf32> to vector<4x9xf32>
    %c0_1 = arith.constant 0 : index
    %c2_2 = arith.constant 2 : index
    %c0_3 = arith.constant 0 : index
    %2 = vector.load %arg2[%c0_1, %c2_2, %c0_3] : memref<4x3x6xf32, #tpu.memory_space<vmem>>, vector<4x1x6xf32>
    %3 = vector.shape_cast %2 : vector<4x1x6xf32> to vector<4x6xf32>
    %c0_4 = arith.constant 0 : index
    %c2_5 = arith.constant 2 : index
    %c0_6 = arith.constant 0 : index
    %4 = vector.load %arg3[%c0_4, %c2_5, %c0_6] : memref<4x3x3xf32, #tpu.memory_space<vmem>>, vector<4x1x3xf32>
    %5 = vector.shape_cast %4 : vector<4x1x3xf32> to vector<4x3xf32>
    %6 = tpu.concatenate %1, %3, %5 in 1 : vector<4x9xf32>, vector<4x6xf32>, vector<4x3xf32> -> vector<4x18xf32>
    %c0_7 = arith.constant 0 : index
    %c0_8 = arith.constant 0 : index
    %7 = vector.load %arg4[%c0_7, %c0_8] : memref<4x18xf32, #tpu.memory_space<vmem>>, vector<4x18xf32>
    tpu.vector_store %arg4[%c0_7, %c0_8], %6 {strides = array<i32>} : memref<4x18xf32, #tpu.memory_space<vmem>>, vector<4x18xf32>,
    return
  }
  func.func @transform_0(%arg0: i32) -> (i32, i32, i32) {
    %c0_i32 = arith.constant 0 : i32
    %c0_i32_0 = arith.constant 0 : i32
    %c0_i32_1 = arith.constant 0 : i32
    return %arg0, %c0_i32, %c0_i32_0 : i32, i32, i32
  }
  func.func @transform_1(%arg0: i32) -> (i32, i32, i32) {
    %c0_i32 = arith.constant 0 : i32
    %c0_i32_0 = arith.constant 0 : i32
    %c0_i32_1 = arith.constant 0 : i32
    return %arg0, %c0_i32, %c0_i32_0 : i32, i32, i32
  }
  func.func @transform_2(%arg0: i32) -> (i32, i32, i32) {
    %c0_i32 = arith.constant 0 : i32
    %c0_i32_0 = arith.constant 0 : i32
    %c0_i32_1 = arith.constant 0 : i32
    return %arg0, %c0_i32, %c0_i32_0 : i32, i32, i32
  }
  func.func @transform_3(%arg0: i32) -> (i32, i32) {
    %c0_i32 = arith.constant 0 : i32
    %c0_i32_0 = arith.constant 0 : i32
    return %arg0, %c0_i32 : i32, i32
  }
}

</mosaic_0001>

<bundles_post_ra>
// kernel: tpu_custom_call.1
= control target key start
LH: loop header
LB: loop body
LE: loop exit
PB: predicated region body
PF: predicated region fallthrough
CT: control target
= control target key end

     0   :  { %vm32_vm0 = vcmask 1041409   ;;  %vm35_vm1 = vcmask 1042434   ;;  %vm38_vm2 = vcmask 1043459   ;;  %s189_s0 = inlined_call_operand.vmem [shape: f32[4,3,9], index: 0, kind: input, shape index: {}]   ;;  %s190_s1 = inlined_call_operand.vmem [shape: f32[4,3,6], index: 1, kind: input, shape index: {}]   ;;  %s191_s2 = inlined_call_operand.vmem [shape: f32[4,3,3], index: 2, kind: input, shape index: {}]   ;;  %s192_s3 = inlined_call_operand.hbm [shape: f32[4,18], index: 3, kind: output, shape index: {}]  }
   0x1   :  { %v19_v0 = vld [vmem:[%s190_s1 + $0x2] sm:$0x1]  ;;  %v20_v1 = vld [vmem:[%s190_s1 + $0x6] sm:$0x1]  ;;  %v21_v2 = vld [vmem:[%s190_s1 + $0xa] sm:$0x1] }
   0x2   :  { %v22_v3 = vld [vmem:[%s190_s1 + $0xe] sm:$0x1]  ;;  %v45_v4 = vrot.slane %v20_v1, 7  ;;  %v47_v5 = vrot.slane %v21_v2, 6  ;;  %v23_v8 = vld [vmem:[%s191_s2 + $0x2] sm:$0x1] }
   0x3   :  { %v49_v6 = vrot.slane %v22_v3, 5  ;;  %v24_v9 = vld [vmem:[%s191_s2 + $0x6] sm:$0x1]  ;;  %v25_v10 = vld [vmem:[%s191_s2 + $0xa] sm:$0x1] }
   0x4   :  { %v46_v7 = vsel %vm32_vm0, %v45_v4, %v19_v0  ;;  %v26_v12 = vld [vmem:[%s191_s2 + $0xe] sm:$0x1]  ;;  %v58_v13 = vrot.slane %v24_v9, 7  ;;  %v60_v14 = vrot.slane %v25_v10, 6 }
   0x5   :  { %v48_v11 = vsel %vm35_vm1, %v47_v5, %v46_v7 }
   0x6   :  { %8 = vsyncpa [#allocation3], 0  ;;  %v50_v15 = vsel %vm38_vm2, %v49_v6, %v48_v11  ;;  %s118_s27 = smov 9   ;;  %v59_v16 = vsel %vm32_vm0, %v58_v13, %v23_v8  ;;  %v62_v17 = vrot.slane %v26_v12, 5  ;;  %s119_s28 = smov 15   ;;  %vm67_vm3 = vcmask 72704  }
   0x7   :  { %51 = vrot.lane.b32.xlu0 %v50_v15, %s118_s27  ;;  %v61_v18 = vsel %vm35_vm1, %v60_v14, %v59_v16  ;;  %v16_v20 = vld [vmem:[%s189_s0 + $0x6] sm:$0x1]  ;;  %v17_v21 = vld [vmem:[%s189_s0 + $0xa] sm:$0x1]  ;;  %v15_v23 = vld [vmem:[%s189_s0 + $0x2] sm:$0x1] }
   0x8   :  { %v63_v19 = vsel %vm38_vm2, %v62_v17, %v61_v18  ;;  %v31_v22 = vrot.slane %v16_v20, 7  ;;  %v18_v24 = vld [vmem:[%s189_s0 + $0xe] sm:$0x1]  ;;  %v34_v25 = vrot.slane %v17_v21, 6  ;;  %s120_s9 = smov [#allocation2]   ;;  %s80_s13 = sshll.u32 %s192_s3, 4  ;;  %s81_s13 = int_to_ptr.hbm [resolvable:$true] %s80_s13 }
   0x9   :  { %v37_v28 = vrot.slane %v18_v24, 5  ;;  %s78_s10 = sshll.u32 %s120_s9, 4  ;;  %vm69_vm4 = vcmask 121856   ;;  %vm71_vm5 = vcmask 142336   ;;  %s79_s10 = int_to_ptr.vmem [resolvable:$true] %s78_s10 }
   0xa   :  { %v33_v26 = vsel %vm32_vm0, %v31_v22, %v15_v23 }
   0xb   :  { %v36_v29 = vsel %vm35_vm1, %v34_v25, %v33_v26 }
   0xc   :  { %v39_v30 = vsel %vm38_vm2, %v37_v28, %v36_v29 }
   0xf   :  { %64 = vrot.lane.b32.xlu0 %v63_v19, %s119_s28 }
  0x79   :  { %v52_v27 = vpop.permute.xlu0 %51 }
  0x7a   :  { %v68_v31 = vsel %vm67_vm3, %v39_v30, %v52_v27 }
  0x81   :  { %v65_v32 = vpop.permute.xlu0 %64 }
  0x82   :  { %v70_v33 = vsel %vm69_vm4, %v68_v31, %v65_v32 }
  0x83   :  { %72 = vst.msk [vmem:[#allocation2] sm:$0xf] %vm71_vm5, %v70_v33 }
  0x84   :  { %83 = dma.vmem_to_hbm [thread:$0]  %s79_s10, 64, %s81_s13, [#allocation3]  }
  0x85   :  { %116 = dma.done.wait [#allocation3], 64  }
  0x86   :  { %117 = vsyncadd [#allocation3], 4294967232 }
  0x87   :  { %88 = vsyncpa [#allocation3], 1 }

</bundles_post_ra>
